<compile_context>
chip_gen: v7x
topology: tpu7x:2x2x1
jax: 0.10.0
libtpu: 0.0.40
codegen_flags: <defaults>
</compile_context>

<pallas_src>
import jax
import jax.numpy as jnp
from jax import lax
from jax.experimental import pallas as pl
from jax.experimental.pallas import tpu as pltpu


def _conv_relu_kernel(x_ref, w_ref, b_ref, o_ref):
    # x_ref: (9*Cin, TH*W)  im2col rows for this (batch, row-tile), lane-dense
    # w_ref: (Cout, 9*Cin)  folded conv weights
    # b_ref: (Cout, 1)      bias column
    # o_ref: (Cout, TH*W)   lane-dense output slab
    acc = jnp.dot(w_ref[...], x_ref[...], preferred_element_type=jnp.float32)
    acc = acc + b_ref[...].astype(jnp.float32)
    o_ref[...] = jnp.maximum(acc, 0.0).astype(o_ref.dtype)


def _pick_row_tile(h, w, cin, itemsize, vmem_cap_bytes=2 * 1024 * 1024):
    """Row-tile height TH: divides H, TH*W is a multiple of 128 (lane-dense
    loads/stores), modest per-block VMEM footprint (v7x-safe with double
    buffering), preferring >=2 tiles so grid=(N, H//TH) keeps both v7x
    TensorCores busy even for small N."""
    cands = [th for th in range(1, h + 1)
             if h % th == 0
             and (th * w) % 128 == 0
             and 9 * cin * th * w * itemsize <= vmem_cap_bytes]
    if not cands:
        return h            # whole-image block (== full array dim) is always legal
    multi = [th for th in cands if h // th >= 2]
    return max(multi) if multi else max(cands)


@jax.jit
def conv_relu_pallas(x_nchw, w_oihw, bias):
    """Conv2d(kernel=3, stride=1, padding=1) + ReLU, PyTorch NCHW/OIHW semantics."""
    N, Cin, H, W = x_nchw.shape
    Cout = w_oihw.shape[0]
    dtype = x_nchw.dtype

    TH = _pick_row_tile(H, W, Cin, jnp.dtype(dtype).itemsize)
    THW = TH * W

    # im2col in the wrapper: 9 (kh, kw)-shifted copies of the zero-padded input,
    # stacked over a tap axis and flattened over (H, W). Row t = (kh*3+kw)*Cin+ci,
    # column m = h*W + w  ->  patches[n, t, m] = x_pad[n, ci, h+kh, w+kw].
    xp = jnp.pad(x_nchw, ((0, 0), (0, 0), (1, 1), (1, 1)))
    patches = jnp.stack(
        [xp[:, :, kh:kh + H, kw:kw + W] for kh in range(3) for kw in range(3)],
        axis=1,
    ).reshape(N, 9 * Cin, H * W)

    # Weights folded to (Cout, 9*Cin) matching the tap ordering above.
    # (For large channel counts on v6e/v7x one would cast patches/w_mat to bf16
    #  here, keeping the f32 accumulation in the kernel.)
    w_mat = jnp.transpose(w_oihw, (0, 2, 3, 1)).reshape(Cout, 9 * Cin).astype(dtype)
    b_col = bias.reshape(Cout, 1).astype(dtype)

    out_flat = pl.pallas_call(
        _conv_relu_kernel,
        out_shape=jax.ShapeDtypeStruct((N, Cout, H * W), dtype),
        grid_spec=pltpu.PrefetchScalarGridSpec(
            num_scalar_prefetch=0,
            grid=(N, H // TH),
            in_specs=[
                # Batch dim squeezed out of the kernel refs (None == size-1, squeezed).
                pl.BlockSpec((None, 9 * Cin, THW), lambda n, i: (n, 0, i)),
                pl.BlockSpec((Cout, 9 * Cin), lambda n, i: (0, 0)),
                pl.BlockSpec((Cout, 1), lambda n, i: (0, 0)),
            ],
            out_specs=pl.BlockSpec((None, Cout, THW), lambda n, i: (n, 0, i)),
        ),
        compiler_params=pltpu.CompilerParams(
            dimension_semantics=("parallel", "parallel")),
    )(patches, w_mat, b_col)

    # Free row-major reshape: (N, Cout, H*W) -> (N, Cout, H, W), already NCHW.
    return out_flat.reshape(N, Cout, H, W)


if __name__ == "__main__":
    # Small shapes consistent with ConvRelu(in_=4, out=8) on a 2x4x16x16 input.
    N, Cin, Cout, H, W = 2, 4, 8, 16, 16
    key = jax.random.PRNGKey(0)
    kx, kw_, kb = jax.random.split(key, 3)

    x = jax.random.normal(kx, (N, Cin, H, W), dtype=jnp.float32)
    # Deterministic init (uniform, kaiming-like bound), shapes per nn.Conv2d(4, 8, 3).
    fan_in = Cin * 3 * 3
    bound = 1.0 / (fan_in ** 0.5)
    w = jax.random.uniform(kw_, (Cout, Cin, 3, 3), jnp.float32, -bound, bound)
    b = jax.random.uniform(kb, (Cout,), jnp.float32, -bound, bound)

    out = conv_relu_pallas(x, w, b)
    out = jax.block_until_ready(out)

    # Reference check against XLA conv (same NCHW/OIHW semantics as PyTorch).
    ref = lax.conv_general_dilated(
        x, w, window_strides=(1, 1), padding=((1, 1), (1, 1)),
        dimension_numbers=("NCHW", "OIHW", "NCHW"))
    ref = jnp.maximum(ref + b.reshape(1, Cout, 1, 1), 0.0)
    assert out.shape == (N, Cout, H, W)
    err = float(jnp.max(jnp.abs(out - ref)))
    assert jnp.allclose(out, ref, atol=1e-4, rtol=1e-4), f"max abs err = {err}"

    print("KERNEL_OK")
</pallas_src>

<mosaic_0001>
module attributes {stable_mosaic.version = 11 : i64} {
  func.func @_conv_relu_kernel(%arg0: i32, %arg1: i32, %arg2: memref<1x36x128xf32, #tpu.memory_space<vmem>>, %arg3: memref<8x36xf32, #tpu.memory_space<vmem>>, %arg4: memref<8x1xf32, #tpu.memory_space<vmem>>, %arg5: memref<1x8x128xf32, #tpu.memory_space<vmem>>) attributes {dimension_semantics = [#tpu.dimension_semantics<parallel>, #tpu.dimension_semantics<parallel>], iteration_bounds = array<i64: 2, 2>, scalar_prefetch = 0 : i64, scratch_operands = 0 : i64, tpu.core_type = #tpu.core_type<tc>, window_params = [{transform_indices = @transform_0, window_bounds = array<i64: 1, 36, 128>}, {pipeline_mode = #tpu.pipeline_mode<synchronous>, transform_indices = @transform_1, window_bounds = array<i64: 8, 36>}, {pipeline_mode = #tpu.pipeline_mode<synchronous>, transform_indices = @transform_2, window_bounds = array<i64: 8, 1>}, {transform_indices = @transform_3, window_bounds = array<i64: 1, 8, 128>}]} {
    %c0 = arith.constant 0 : index
    %c0_0 = arith.constant 0 : index
    %0 = vector.load %arg3[%c0, %c0_0] : memref<8x36xf32, #tpu.memory_space<vmem>>, vector<8x36xf32>
    %c0_1 = arith.constant 0 : index
    %c0_2 = arith.constant 0 : index
    %c0_3 = arith.constant 0 : index
    %1 = vector.load %arg2[%c0_1, %c0_2, %c0_3] : memref<1x36x128xf32, #tpu.memory_space<vmem>>, vector<1x36x128xf32>
    %2 = vector.shape_cast %1 : vector<1x36x128xf32> to vector<36x128xf32>
    %cst = arith.constant dense<0.000000e+00> : vector<8x128xf32>
    %3 = tpu.matmul %0, %2, %cst {dimension_numbers = #tpu.dot_dimension_numbers<[1], [0], [0], [1], [0, 0, 1, 1], [], []>} : vector<8x36xf32>, vector<36x128xf32>, vector<8x128xf32> -> vector<8x128xf32>
    %c0_4 = arith.constant 0 : index
    %c0_5 = arith.constant 0 : index
    %4 = vector.load %arg4[%c0_4, %c0_5] : memref<8x1xf32, #tpu.memory_space<vmem>>, vector<8x1xf32>
    %5 = vector.broadcast %4 : vector<8x1xf32> to vector<8x128xf32>
    %6 = arith.addf %3, %5 : vector<8x128xf32>
    %cst_6 = arith.constant 0.000000e+00 : f32
    %7 = vector.broadcast %cst_6 : f32 to vector<8x128xf32>
    %8 = arith.maximumf %6, %7 : vector<8x128xf32>
    %c0_7 = arith.constant 0 : index
    %c0_8 = arith.constant 0 : index
    %c0_9 = arith.constant 0 : index
    %9 = vector.load %arg5[%c0_7, %c0_8, %c0_9] : memref<1x8x128xf32, #tpu.memory_space<vmem>>, vector<1x8x128xf32>
    %10 = vector.shape_cast %9 : vector<1x8x128xf32> to vector<8x128xf32>
    %11 = vector.shape_cast %8 : vector<8x128xf32> to vector<1x8x128xf32>
    tpu.vector_store %arg5[%c0_7, %c0_8, %c0_9], %11 {strides = array<i32>} : memref<1x8x128xf32, #tpu.memory_space<vmem>>, vector<1x8x128xf32>,
    return
  }
  func.func @transform_0(%arg0: i32, %arg1: i32) -> (i32, i32, i32) {
    %c0_i32 = arith.constant 0 : i32
    %c0_i32_0 = arith.constant 0 : i32
    return %arg0, %c0_i32, %arg1 : i32, i32, i32
  }
  func.func @transform_1(%arg0: i32, %arg1: i32) -> (i32, i32) {
    %c0_i32 = arith.constant 0 : i32
    %c0_i32_0 = arith.constant 0 : i32
    %c0_i32_1 = arith.constant 0 : i32
    return %c0_i32, %c0_i32_0 : i32, i32
  }
  func.func @transform_2(%arg0: i32, %arg1: i32) -> (i32, i32) {
    %c0_i32 = arith.constant 0 : i32
    %c0_i32_0 = arith.constant 0 : i32
    %c0_i32_1 = arith.constant 0 : i32
    return %c0_i32, %c0_i32_0 : i32, i32
  }
  func.func @transform_3(%arg0: i32, %arg1: i32) -> (i32, i32, i32) {
    %c0_i32 = arith.constant 0 : i32
    %c0_i32_0 = arith.constant 0 : i32
    return %arg0, %c0_i32, %arg1 : i32, i32, i32
  }
}

</mosaic_0001>

<bundles_post_ra>
// kernel: conv_relu_pallas.1
= control target key start
LH: loop header
LB: loop body
LE: loop exit
PB: predicated region body
PF: predicated region fallthrough
CT: control target
= control target key end

     0   :  { %s606_s12 = smov 0   ;;  %s608_s13 = smov 0   ;;  %s703_s0 = inlined_call_operand.vmem [shape: f32[2,36,256], index: 0, kind: input, shape index: {}]   ;;  %s704_s1 = inlined_call_operand.vmem [shape: f32[8,36], index: 1, kind: input, shape index: {}]   ;;  %s705_s2 = inlined_call_operand.vmem [shape: f32[8,1], index: 2, kind: input, shape index: {}]   ;;  %s706_s3 = inlined_call_operand.vmem [shape: f32[2,8,256], index: 3, kind: output, shape index: {}]  }
   0x1   :  { %s610_s14 = smov 0   ;;  %s612_s15 = smov 0  }
   0x2   :  { %s614_s16 = smov 0   ;;  %s616_s17 = smov 0  }
   0x3   :  { %s618_s18 = smov 0  }
   0x4 LB: > { %s22_s19 = sadd.s32 1, %s572_s16  ;;  %s25_s20 = sadd.s32 1, %s576_s17  ;;  %s580_s18 = sphi %s618_s18, %s13_s18   ;;  %s576_s17 = sphi %s616_s17, %s712_s17   ;;  %s572_s16 = sphi %s614_s16, %s711_s16   ;;  %s568_s15 = sphi %s612_s15, %s710_s15   ;;  %s564_s14 = sphi %s610_s14, %s709_s14   ;;  %s560_s13 = sphi %s608_s13, %s708_s13   ;;  %s556_s12 = sphi %s606_s12, %s707_s12  }
   0x5   : > { %p23_p0 = scmp.ge.s32.totalorder %s22_s19, 2  ;;  %p41_p1 = scmp.ne.s32.totalorder %s560_s13, %s556_s12 }
   0x6   : > { %p42_p2 = scmp.eq.s32.totalorder %s580_s18, 0  ;;  %s34_s24 = sadd.s32 1, %s560_s13 }
   0x7   : > { %s714_s19 = smov (%p23_p0, %s22_s19), 0  ;;  %s716_s20 = smov (!%p23_p0, %s25_s20), %s576_s17 }
   0x8   : > { %p43_p3 = por %p42_p2, %p41_p1  ;;  %p27_p4 = scmp.ge.s32.totalorder %s716_s20, 2 }
   0x9   : > { %s30_s21 = ssub.s32 %s572_s16, %s714_s19  ;;  %p428_p6 = scmp.ge.s32.totalorder %s580_s18, 4 }
   0xa   : > { %s718_s20 = smov (%p27_p4, %s716_s20), 0 }
   0xb   : > { %s29_s22 = ssub.s32 %s576_s17, %s718_s20  ;;  %143 = sbr.rel (%p428_p6) target bundleno = 28 (0x1c), region = 24 }
   0xc   : > { %s31_s23 = sor.u32 %s30_s21, %s29_s22 }
   0xd   : > { %p32_p5 = scmp.eq.s32.totalorder %s31_s23, 0 }
   0xf   : > { %s657_s25 = scalar_select %p32_p5, %s560_s13, %s34_s24  }
  0x12   : > { %146 = sbr.rel (!%p43_p3) target bundleno = 28 (0x1c), region = 28  ;;  %s148_s26 = sand.u32 (%p43_p3), 1, %s560_s13  }
  0x13   : > { %s463_s27 = smul.u32 (%p43_p3), 10, %s576_s17 }
  0x14   : > { %s462_s28 = smul.u32 (%p43_p3), 40, %s148_s26 }
  0x15   : > { %s152_s29 = sadd.s32 (%p43_p3), %s572_s16, %s463_s27 }
  0x16   : > { %s429_s30 = sshll.u32 (%p43_p3), %s152_s29, 3  ;;  %s150_s7 = scalar_lea.vmem (%p43_p3), [#allocation2], %s462_s28 }
  0x17   : > { %s154_s6 = scalar_lea.vmem (%p43_p3), %s703_s0, %s429_s30 }
  0x18   : > { %v190_v0 = vld [vmem:[%s154_s6] sm:$0xff] (%p43_p3)  ;;  %v192_v1 = vld [vmem:[%s154_s6 + $0x10] sm:$0xff] (%p43_p3) }
  0x19   : > { %v194_v2 = vld [vmem:[%s154_s6 + $0x20] sm:$0xff]  ;;  %191 = vst [vmem:[%s150_s7] sm:$0xff] %v190_v0  ;;  %193 = vst [vmem:[%s150_s7 + $0x8] sm:$0xff] %v192_v1  ;;  %v196_v3 = vld [vmem:[%s154_s6 + $0x30] sm:$0xff] }
  0x1a   : > { %195 = vst [vmem:[%s150_s7 + $0x10] sm:$0xff] %v194_v2  ;;  %v198_v4 = vld [vmem:[%s154_s6 + $0x40] sm:$0xff]  ;;  %197 = vst [vmem:[%s150_s7 + $0x18] sm:$0xff] %v196_v3 }
  0x1b   : > { %199 = vst [vmem:[%s150_s7 + $0x20] sm:$0xff] %v198_v4 }
  0x1c PF: > { %p430_p7 = scmp.ge.s32.totalorder %s580_s18, 1  ;;  %p204_p8 = scmp.lt.s32.totalorder %s580_s18, 5 }
  0x1e   : > { %p205_p9 = pnand %p430_p7, %p204_p8 }
  0x1f   : > { %s211_s8 = sand.u32 (!%p205_p9), 1, %s556_s12   ;;  %v582_v5 = vmov (!%p205_p9), 0.0|0.0   ;;  %vm583_vm0 = vmmov (!%p205_p9), 0   ;;  %v584_v6 = vmov (!%p205_p9), 0.0   ;;  %v251_v7 = vld [vmem:[%s705_s2] sm:$0xff] (!%p205_p9)  ;;  %v585_v8 = vmov (!%p205_p9), 0  }
  0x20   : > { %208 = sbr.rel (%p205_p9) target bundleno = 265 (0x109), region = 66  ;;  %456 = vmatprep.subr.bf16.mxu0 (!%p205_p9), %v582_v5  ;;  %453 = vmatprep.mubr.msk.f32.mxu0 (!%p205_p9), %vm583_vm0, %v584_v6  ;;  %vm261_vm1 = vcmask (!%p205_p9), 1043456   ;;  %v245_v16 = vld [vmem:[%s704_s1] sm:$0xff] (!%p205_p9)  ;;  %vm257_vm2 = vcmask (!%p205_p9), 293888   ;;  %p237_p10 = scmp.lt.s32.totalorder (!%p205_p9), %s568_s15, 1 }
  0x21   : > { %s464_s9 = smul.u32 (!%p205_p9), 40, %s211_s8  ;;  %525 = vset.pattern.permute.xlu0 (!%p205_p9), %v585_v8  ;;  %p239_p11 = scmp.lt.s32.totalorder (!%p205_p9), %s564_s14, 1 }
  0x22   : > { %254 = vperm.xlu0 (!%p205_p9), %525, %v251_v7  }
  0x23   : > { %s213_s21 = scalar_lea.vmem (!%p205_p9), [#allocation2], %s464_s9 }
  0x24   : > { %v246_v9 = vld [vmem:[%s213_s21] sm:$0xff] (!%p205_p9)  ;;  %v247_v10 = vld [vmem:[%s213_s21 + $0x8] sm:$0xff] (!%p205_p9)  ;;  %v248_v11 = vld [vmem:[%s213_s21 + $0x10] sm:$0xff] (!%p205_p9) }
  0x25   : > { %v457_v12 = vpack.c.bf16 (!%p205_p9), %v247_v10, %v246_v9  ;;  %v249_v13 = vld [vmem:[%s213_s21 + $0x18] sm:$0xff] (!%p205_p9)  ;;  %v250_v15 = vld [vmem:[%s213_s21 + $0x20] sm:$0xf] (!%p205_p9) }
  0x26   : > { %v460_v14 = vpack.c.bf16 (!%p205_p9), %v249_v13, %v248_v11 }
  0x27   : > { %458 = vmatpush3.bf16.msra.mxu0 %v457_v12  ;;  %s720_s15 = smov (!%p237_p10, %s568_s15), 1  ;;  %s722_s14 = smov (!%p239_p11, %s564_s14), 1 }
  0x28   : > { %459 = vmatprep.subr.bf16.mxu0 %v582_v5  ;;  %s431_s23 = sshll.u32 %s720_s15, 1 }
  0x29   : > { %s242_s24 = sadd.s32 %s431_s23, %s722_s14 }
  0x2a   : > { %s432_s26 = sshll.u32 %s242_s24, 3 }
  0x2b   : > { %461 = vmatpush3.bf16.msra.mxu0 %v460_v14  ;;  %s244_s29 = scalar_lea.vmem %s706_s3, %s432_s26 }
  0x2c   : > { %451 = vmatprep.subr.mxu0 %v584_v6 }
  0x2f   : > { %452 = vmatpush3.msk.msra.mxu0 %vm261_vm1, %v250_v15 }
  0x30   : > { %454 = vmatmul.mubr.msk.f32.vlgmr.msra.gmra.mrb[0].mxu0 %vm257_vm2, %v245_v16 }
  0xa1   : > { %v255_v17 = vpop.permute.xlu0 %254 }
 0x103   : > { %v331_v18 = vpop.f32.mrb[0].mxu0 }
 0x104   : > { %v332_v19 = vadd.f32 %v331_v18, %v255_v17  ;;  %v455_v20 = vpop.f32.mrb[1].mxu0 }
 0x106   : > { %v335_v21 = vmax.f32 %v332_v19, 0.0 }
 0x108   : > { %336 = vst [vmem:[%s244_s29] sm:$0xff] %v335_v21 }
 0x109 PF: > { %s13_s18 = sadd.s32 1, %s580_s18   ;;  %s707_s12 = smov %s560_s13 }
 0x10a   : > { %p10_p12 = scmp.ge.s32.totalorder %s13_s18, 6   ;;  %s708_s13 = smov %s657_s25 }
 0x10b   : > { %s709_s14 = smov %s572_s16  ;;  %s710_s15 = smov %s576_s17 }
 0x10c   : > { %s711_s16 = smov %s714_s19  ;;  %s712_s17 = smov %s718_s20 }
 0x10d   :  { %12 = sbr.rel (!%p10_p12) target bundleno = 4 (0x4), region = 105 }

</bundles_post_ra>
